<compile_context>
chip_gen: v7x
topology: tpu7x:2x2x1
jax: 0.10.0
libtpu: 0.0.40
codegen_flags: <defaults>
</compile_context>

<pallas_src>
import functools

import jax
import jax.numpy as jnp
from jax.experimental import pallas as pl
from jax.experimental.pallas import tpu as pltpu

LANE = 128


def _round_up(x, m):
    return (x + m - 1) // m * m


# ----------------------------------------------------------------------------
# Kernel 1: 1x1 conv (channel matmul, BN scale folded into weights) + bias
#           + LeakyReLU.  Output channels padded to a multiple of 128.
# ----------------------------------------------------------------------------
def _conv1x1_kernel(x_ref, w_ref, b_ref, o_ref, *, leaky):
    # x_ref: (tile_r, Cin)  w_ref: (Cin, Cp)  b_ref: (1, Cp)  o_ref: (tile_r, Cp)
    y = jnp.dot(x_ref[...], w_ref[...], preferred_element_type=jnp.float32)
    y = y + b_ref[...]
    y = jnp.where(y >= 0, y, leaky * y)
    o_ref[...] = y.astype(o_ref.dtype)


def conv1x1_bn_leaky(x_nhwc, w_folded, bias, leaky, *, target_tile=1024):
    """x_nhwc: (N,H,W,Cin), w_folded: (Cin,Cp), bias: (Cp,) -> (N,H,W,Cp)."""
    N, H, W, Cin = x_nhwc.shape
    Cp = w_folded.shape[1]
    R = N * H * W
    x2 = x_nhwc.reshape(R, Cin)

    if R <= target_tile:
        tile_r, Rp = R, R
    else:
        tile_r = target_tile
        Rp = _round_up(R, tile_r)
        if Rp != R:                      # tail handling: pad rows, slice after
            x2 = jnp.pad(x2, ((0, Rp - R), (0, 0)))

    out = pl.pallas_call(
        functools.partial(_conv1x1_kernel, leaky=leaky),
        out_shape=jax.ShapeDtypeStruct((Rp, Cp), x_nhwc.dtype),
        grid=(Rp // tile_r,),
        in_specs=[
            pl.BlockSpec((tile_r, Cin), lambda i: (i, 0)),
            pl.BlockSpec((Cin, Cp), lambda i: (0, 0)),
            pl.BlockSpec((1, Cp), lambda i: (0, 0)),
        ],
        out_specs=pl.BlockSpec((tile_r, Cp), lambda i: (i, 0)),
        compiler_params=pltpu.CompilerParams(
            dimension_semantics=("parallel",)),
    )(x2, w_folded, bias.reshape(1, Cp))
    if Rp != R:
        out = out[:R]
    return out.reshape(N, H, W, Cp)


# ----------------------------------------------------------------------------
# Kernel 2: fused (lateral add) + zero-pad (via VMEM scratch) + 3x3 conv
#           (stride 1, pad 1) + bias + LeakyReLU.  BN scale folded into w.
# ----------------------------------------------------------------------------
def _merge3x3_kernel(x_ref, u_ref, w_ref, b_ref, o_ref, pad_ref, acc_ref,
                     *, H, W, leaky):
    # x_ref, u_ref: (1, H, W, Cp)   w_ref: (3, 3, Cp, Cp)   b_ref: (1, Cp)
    # pad_ref: VMEM (H+2, W+2, Cp)  acc_ref: VMEM (H*W, Cp) f32
    Cp = b_ref.shape[-1]

    # Zero-padded, fused lateral sum living entirely in VMEM (no HBM copies).
    pad_ref[...] = jnp.zeros_like(pad_ref)
    pad_ref[1:H + 1, 1:W + 1, :] = x_ref[0] + u_ref[0]

    acc_ref[...] = jnp.zeros_like(acc_ref)
    for ky in range(3):                 # 9 shifted channel-matmuls on the MXU
        for kx in range(3):
            patch = pad_ref[ky:ky + H, kx:kx + W, :].reshape(H * W, Cp)
            acc_ref[...] += jnp.dot(patch, w_ref[ky, kx],
                                    preferred_element_type=jnp.float32)

    y = acc_ref[...] + b_ref[...]
    y = jnp.where(y >= 0, y, leaky * y)
    o_ref[...] = y.reshape(1, H, W, Cp).astype(o_ref.dtype)


def merge3x3_bn_leaky(x_nhwc, up_nhwc, w_folded, bias, leaky):
    """(x + up) -> 3x3 conv (s1,p1) -> +bias -> LeakyReLU, all in-kernel."""
    N, H, W, Cp = x_nhwc.shape
    # TODO(synk): for production feature-map sizes, tile over output rows
    # (halo via manual DMA) instead of whole-image blocks per grid step.
    return pl.pallas_call(
        functools.partial(_merge3x3_kernel, H=H, W=W, leaky=leaky),
        out_shape=jax.ShapeDtypeStruct((N, H, W, Cp), x_nhwc.dtype),
        grid=(N,),
        in_specs=[
            pl.BlockSpec((1, H, W, Cp), lambda n: (n, 0, 0, 0)),
            pl.BlockSpec((1, H, W, Cp), lambda n: (n, 0, 0, 0)),
            pl.BlockSpec((3, 3, Cp, Cp), lambda n: (0, 0, 0, 0)),
            pl.BlockSpec((1, Cp), lambda n: (0, 0)),
        ],
        out_specs=pl.BlockSpec((1, H, W, Cp), lambda n: (n, 0, 0, 0)),
        scratch_shapes=[
            pltpu.VMEM((H + 2, W + 2, Cp), jnp.float32),
            pltpu.VMEM((H * W, Cp), jnp.float32),
        ],
        compiler_params=pltpu.CompilerParams(
            dimension_semantics=("parallel",),
            vmem_limit_bytes=48 * 1024 * 1024),
    )(x_nhwc, up_nhwc, w_folded, bias.reshape(1, Cp))


# ----------------------------------------------------------------------------
# Glue: nearest-neighbor resize (matches F.interpolate(mode='nearest'))
# TODO(synk): in-kernel fusion of this gather into the merge kernel.
# ----------------------------------------------------------------------------
def nearest_resize_nhwc(x, out_h, out_w):
    N, H, W, C = x.shape
    hi = (jnp.arange(out_h) * H // out_h).astype(jnp.int32)
    wi = (jnp.arange(out_w) * W // out_w).astype(jnp.int32)
    return x[:, hi][:, :, wi]


# ----------------------------------------------------------------------------
# Parameter construction (deterministic, synthetic) + BN fold / lane padding
# ----------------------------------------------------------------------------
def _bn_fold(key, c):
    k1, k2, k3, k4 = jax.random.split(key, 4)
    gamma = 1.0 + 0.1 * jax.random.normal(k1, (c,), jnp.float32)
    beta = 0.1 * jax.random.normal(k2, (c,), jnp.float32)
    mean = 0.1 * jax.random.normal(k3, (c,), jnp.float32)
    var = jax.random.uniform(k4, (c,), jnp.float32, 0.5, 1.5)
    eps = 1e-5
    scale = gamma / jnp.sqrt(var + eps)
    bias = beta - mean * scale
    return scale, bias


def init_fpn_params(key, in_channels_list, out_channels):
    """Raw (unfolded, unpadded) parameters; used directly by the reference."""
    ks = jax.random.split(key, 10)
    p = {}
    for idx, cin in enumerate(in_channels_list):
        w = 0.1 * jax.random.normal(ks[idx], (cin, out_channels), jnp.float32)
        s, b = _bn_fold(ks[idx + 3], out_channels)
        p[f"output{idx + 1}"] = (w, s, b)
    for j, name in enumerate(["merge1", "merge2"]):
        w = 0.1 * jax.random.normal(
            ks[6 + j], (3, 3, out_channels, out_channels), jnp.float32)
        s, b = _bn_fold(ks[8 + j], out_channels)
        p[name] = (w, s, b)
    return p


def prepare_kernel_params(params, out_channels):
    """Fold BN scale into the conv weights, pad Cout (and 3x3 Cin) to 128."""
    Cp = _round_up(out_channels, LANE)
    pad_c = Cp - out_channels
    kp = {}
    for idx in (1, 2, 3):
        w, s, b = params[f"output{idx}"]                  # w: (Cin, Cout)
        wf = jnp.pad(w * s[None, :], ((0, 0), (0, pad_c)))
        bf = jnp.pad(b, (0, pad_c))
        kp[f"output{idx}"] = (wf, bf)
    for name in ("merge1", "merge2"):
        w, s, b = params[name]                            # w: (3,3,Cout,Cout)
        wf = jnp.pad(w * s[None, None, None, :],
                     ((0, 0), (0, 0), (0, pad_c), (0, pad_c)))
        bf = jnp.pad(b, (0, pad_c))
        kp[name] = (wf, bf)
    return kp, Cp


# ----------------------------------------------------------------------------
# FPN forward (Pallas) and pure-JAX reference
# ----------------------------------------------------------------------------
def fpn_forward(kparams, inputs_nchw, out_channels):
    """inputs_nchw: list of 3 NCHW tensors (like dict(input).values())."""
    leaky = 0.1 if out_channels <= 64 else 0.0
    x1, x2, x3 = [jnp.transpose(x, (0, 2, 3, 1)) for x in inputs_nchw]

    o1 = conv1x1_bn_leaky(x1, *kparams["output1"], leaky)
    o2 = conv1x1_bn_leaky(x2, *kparams["output2"], leaky)
    o3 = conv1x1_bn_leaky(x3, *kparams["output3"], leaky)

    up3 = nearest_resize_nhwc(o3, o2.shape[1], o2.shape[2])
    o2 = merge3x3_bn_leaky(o2, up3, *kparams["merge2"], leaky)

    up2 = nearest_resize_nhwc(o2, o1.shape[1], o1.shape[2])
    o1 = merge3x3_bn_leaky(o1, up2, *kparams["merge1"], leaky)

    # back to NCHW and slice away the lane-padding channels
    return [jnp.transpose(o, (0, 3, 1, 2))[:, :out_channels]
            for o in (o1, o2, o3)]


def _ref_conv_bn_leaky(x, w_hwio, scale, bias, leaky, pad):
    y = jax.lax.conv_general_dilated(
        x, w_hwio, (1, 1), pad, dimension_numbers=("NHWC", "HWIO", "NHWC"))
    y = y * scale + bias
    return jnp.where(y >= 0, y, leaky * y)


def fpn_forward_ref(params, inputs_nchw, out_channels):
    leaky = 0.1 if out_channels <= 64 else 0.0
    x1, x2, x3 = [jnp.transpose(x, (0, 2, 3, 1)) for x in inputs_nchw]

    def c1(x, prm):
        w, s, b = prm
        return _ref_conv_bn_leaky(x, w[None, None], s, b, leaky,
                                  [(0, 0), (0, 0)])

    def c3(x, prm):
        w, s, b = prm
        return _ref_conv_bn_leaky(x, w, s, b, leaky, [(1, 1), (1, 1)])

    o1 = c1(x1, params["output1"])
    o2 = c1(x2, params["output2"])
    o3 = c1(x3, params["output3"])
    o2 = c3(o2 + nearest_resize_nhwc(o3, o2.shape[1], o2.shape[2]),
            params["merge2"])
    o1 = c3(o1 + nearest_resize_nhwc(o2, o1.shape[1], o1.shape[2]),
            params["merge1"])
    return [jnp.transpose(o, (0, 3, 1, 2)) for o in (o1, o2, o3)]


if __name__ == "__main__":
    key = jax.random.PRNGKey(0)
    in_channels_list = [4, 8, 16]
    out_channels = 8                     # <= 64 -> leaky = 0.1 (as in PyTorch)

    k_in1, k_in2, k_in3, k_par = jax.random.split(key, 4)
    # FPN pyramid inputs (dict values in the PyTorch module), NCHW:
    x_c2 = jax.random.normal(k_in1, (2, 4, 16, 16), jnp.float32)
    x_c3 = jax.random.normal(k_in2, (2, 8, 8, 8), jnp.float32)
    x_c4 = jax.random.normal(k_in3, (2, 16, 4, 4), jnp.float32)
    inputs = [x_c2, x_c3, x_c4]

    params = init_fpn_params(k_par, in_channels_list, out_channels)
    kparams, _ = prepare_kernel_params(params, out_channels)

    outs = fpn_forward(kparams, inputs, out_channels)
    outs = [jax.block_until_ready(o) for o in outs]

    refs = fpn_forward_ref(params, inputs, out_channels)
    for o, r in zip(outs, refs):
        assert o.shape == r.shape and o.dtype == r.dtype
        assert jnp.allclose(o, r, atol=1e-4, rtol=1e-4), "mismatch vs reference"

    print("KERNEL_OK")
</pallas_src>

<mosaic_0001>
module attributes {stable_mosaic.version = 11 : i64} {
  func.func @_conv1x1_kernel(%arg0: i32, %arg1: memref<512x4xf32, #tpu.memory_space<vmem>>, %arg2: memref<4x128xf32, #tpu.memory_space<vmem>>, %arg3: memref<1x128xf32, #tpu.memory_space<vmem>>, %arg4: memref<512x128xf32, #tpu.memory_space<vmem>>) attributes {dimension_semantics = [#tpu.dimension_semantics<parallel>], iteration_bounds = array<i64: 1>, scalar_prefetch = 0 : i64, scratch_operands = 0 : i64, tpu.core_type = #tpu.core_type<tc>, window_params = [{transform_indices = @transform_0, window_bounds = array<i64: 512, 4>}, {pipeline_mode = #tpu.pipeline_mode<synchronous>, transform_indices = @transform_1, window_bounds = array<i64: 4, 128>}, {pipeline_mode = #tpu.pipeline_mode<synchronous>, transform_indices = @transform_2, window_bounds = array<i64: 1, 128>}, {transform_indices = @transform_3, window_bounds = array<i64: 512, 128>}]} {
    %c0 = arith.constant 0 : index
    %c0_0 = arith.constant 0 : index
    %0 = vector.load %arg1[%c0, %c0_0] : memref<512x4xf32, #tpu.memory_space<vmem>>, vector<512x4xf32>
    %c0_1 = arith.constant 0 : index
    %c0_2 = arith.constant 0 : index
    %1 = vector.load %arg2[%c0_1, %c0_2] : memref<4x128xf32, #tpu.memory_space<vmem>>, vector<4x128xf32>
    %cst = arith.constant dense<0.000000e+00> : vector<512x128xf32>
    %2 = tpu.matmul %0, %1, %cst {dimension_numbers = #tpu.dot_dimension_numbers<[1], [0], [0], [1], [0, 0, 1, 1], [], []>} : vector<512x4xf32>, vector<4x128xf32>, vector<512x128xf32> -> vector<512x128xf32>
    %c0_3 = arith.constant 0 : index
    %c0_4 = arith.constant 0 : index
    %3 = vector.load %arg3[%c0_3, %c0_4] : memref<1x128xf32, #tpu.memory_space<vmem>>, vector<1x128xf32>
    %4 = vector.broadcast %3 : vector<1x128xf32> to vector<512x128xf32>
    %5 = arith.addf %2, %4 : vector<512x128xf32>
    %cst_5 = arith.constant 0.000000e+00 : f32
    %6 = vector.broadcast %cst_5 : f32 to vector<512x128xf32>
    %7 = arith.cmpf oge, %5, %6 : vector<512x128xf32>
    %cst_6 = arith.constant 1.000000e-01 : f32
    %8 = vector.broadcast %cst_6 : f32 to vector<512x128xf32>
    %9 = arith.mulf %8, %5 : vector<512x128xf32>
    %10 = arith.select %7, %5, %9 : vector<512x128xi1>, vector<512x128xf32>
    %c0_7 = arith.constant 0 : index
    %c0_8 = arith.constant 0 : index
    %11 = vector.load %arg4[%c0_7, %c0_8] : memref<512x128xf32, #tpu.memory_space<vmem>>, vector<512x128xf32>
    tpu.vector_store %arg4[%c0_7, %c0_8], %10 {strides = array<i32>} : memref<512x128xf32, #tpu.memory_space<vmem>>, vector<512x128xf32>,
    return
  }
  func.func @transform_0(%arg0: i32) -> (i32, i32) {
    %c0_i32 = arith.constant 0 : i32
    %c0_i32_0 = arith.constant 0 : i32
    return %arg0, %c0_i32 : i32, i32
  }
  func.func @transform_1(%arg0: i32) -> (i32, i32) {
    %c0_i32 = arith.constant 0 : i32
    %c0_i32_0 = arith.constant 0 : i32
    %c0_i32_1 = arith.constant 0 : i32
    return %c0_i32, %c0_i32_0 : i32, i32
  }
  func.func @transform_2(%arg0: i32) -> (i32, i32) {
    %c0_i32 = arith.constant 0 : i32
    %c0_i32_0 = arith.constant 0 : i32
    %c0_i32_1 = arith.constant 0 : i32
    return %c0_i32, %c0_i32_0 : i32, i32
  }
  func.func @transform_3(%arg0: i32) -> (i32, i32) {
    %c0_i32 = arith.constant 0 : i32
    %c0_i32_0 = arith.constant 0 : i32
    return %arg0, %c0_i32 : i32, i32
  }
}

</mosaic_0001>

<bundles_post_ra>
// kernel: tpu_custom_call.1
= control target key start
LH: loop header
LB: loop body
LE: loop exit
PB: predicated region body
PF: predicated region fallthrough
CT: control target
= control target key end

     0   :  { %vm280_vm0 = vcmask 1043456   ;;  %vm87_vm1 = vcmask 31744   ;;  %s1562_s0 = inlined_call_operand.vmem [shape: f32[512,4], index: 0, kind: input, shape index: {}]   ;;  %s1563_s1 = inlined_call_operand.vmem [shape: f32[4,128], index: 1, kind: input, shape index: {}]   ;;  %s1564_s2 = inlined_call_operand.vmem [shape: f32[1,128], index: 2, kind: input, shape index: {}]   ;;  %s1565_s3 = inlined_call_operand.hbm [shape: f32[512,128], index: 3, kind: output, shape index: {}]  }
   0x1   :  { %v79_v0 = vld [vmem:[%s1563_s1] sm:$0xf]  ;;  %v16_v3 = vld [vmem:[%s1562_s0 + $0x8] sm:$0xff]  ;;  %v17_v5 = vld [vmem:[%s1562_s0 + $0x10] sm:$0xff] }
   0x2   :  { %v15_v1 = vld [vmem:[%s1562_s0] sm:$0xff]  ;;  %1072 = vmatprep.subr.msk.mxu0 %vm280_vm0, %v79_v0  ;;  %1170 = vmatprep.subr.msk.mxu1 %vm280_vm0, %v79_v0  ;;  %v48_v4 = vld [vmem:[%s1562_s0 + $0x108] sm:$0xff]  ;;  %v49_v6 = vld [vmem:[%s1562_s0 + $0x110] sm:$0xff] }
   0x3   :  { %v47_v2 = vld [vmem:[%s1562_s0 + $0x100] sm:$0xff]  ;;  %1073 = vmatpush3.msk.msra.mxu0 %vm280_vm0, %v79_v0  ;;  %1171 = vmatpush3.msk.msra.mxu1 %vm280_vm0, %v79_v0  ;;  %v18_v7 = vld [vmem:[%s1562_s0 + $0x18] sm:$0xff]  ;;  %v20_v11 = vld [vmem:[%s1562_s0 + $0x28] sm:$0xff] }
   0x4   :  { %1074 = vmatprep.mubr.msk.f32.mxu0 %vm87_vm1, %v15_v1  ;;  %1122 = vmatprep.mubr.msk.f32.mxu1 %vm87_vm1, %v47_v2  ;;  %v50_v8 = vld [vmem:[%s1562_s0 + $0x118] sm:$0xff]  ;;  %v19_v9 = vld [vmem:[%s1562_s0 + $0x20] sm:$0xff]  ;;  %v52_v12 = vld [vmem:[%s1562_s0 + $0x128] sm:$0xff] }
   0x5   :  { %1075 = vmatmul.mubr.msk.f32.vlgmr.msra.gmra.mrb[0].mxu0 %vm87_vm1, %v16_v3  ;;  %1123 = vmatmul.mubr.msk.f32.vlgmr.msra.gmra.mrb[0].mxu1 %vm87_vm1, %v48_v4  ;;  %v51_v10 = vld [vmem:[%s1562_s0 + $0x120] sm:$0xff]  ;;  %v21_v13 = vld [vmem:[%s1562_s0 + $0x30] sm:$0xff]  ;;  %v22_v15 = vld [vmem:[%s1562_s0 + $0x38] sm:$0xff] }
   0x6   :  { %1077 = vmatprep.mubr.msk.f32.mxu0 %vm87_vm1, %v17_v5  ;;  %1125 = vmatprep.mubr.msk.f32.mxu1 %vm87_vm1, %v49_v6  ;;  %v53_v14 = vld [vmem:[%s1562_s0 + $0x130] sm:$0xff]  ;;  %v54_v16 = vld [vmem:[%s1562_s0 + $0x138] sm:$0xff]  ;;  %v23_v17 = vld [vmem:[%s1562_s0 + $0x40] sm:$0xff] }
   0x7   :  { %v55_v18 = vld [vmem:[%s1562_s0 + $0x140] sm:$0xff]  ;;  %v24_v19 = vld [vmem:[%s1562_s0 + $0x48] sm:$0xff]  ;;  %v25_v21 = vld [vmem:[%s1562_s0 + $0x50] sm:$0xff] }
   0x8   :  { %v56_v20 = vld [vmem:[%s1562_s0 + $0x148] sm:$0xff]  ;;  %v57_v22 = vld [vmem:[%s1562_s0 + $0x150] sm:$0xff]  ;;  %v26_v23 = vld [vmem:[%s1562_s0 + $0x58] sm:$0xff] }
   0x9   :  { %1078 = vmatmul.mubr.msk.f32.gmra.mrb[2].mxu0 %vm87_vm1, %v18_v7  ;;  %1126 = vmatmul.mubr.msk.f32.gmra.mrb[2].mxu1 %vm87_vm1, %v50_v8  ;;  %v58_v24 = vld [vmem:[%s1562_s0 + $0x158] sm:$0xff] }
   0xa   :  { %1080 = vmatprep.mubr.msk.f32.mxu0 %vm87_vm1, %v19_v9  ;;  %1128 = vmatprep.mubr.msk.f32.mxu1 %vm87_vm1, %v51_v10 }
   0xd   :  { %1081 = vmatmul.mubr.msk.f32.gmra.mrb[4].mxu0 %vm87_vm1, %v20_v11  ;;  %1129 = vmatmul.mubr.msk.f32.gmra.mrb[4].mxu1 %vm87_vm1, %v52_v12 }
   0xe   :  { %1083 = vmatprep.mubr.msk.f32.mxu0 %vm87_vm1, %v21_v13  ;;  %1131 = vmatprep.mubr.msk.f32.mxu1 %vm87_vm1, %v53_v14 }
  0x11   :  { %1084 = vmatmul.mubr.msk.f32.gmra.mrb[6].mxu0 %vm87_vm1, %v22_v15  ;;  %1132 = vmatmul.mubr.msk.f32.gmra.mrb[6].mxu1 %vm87_vm1, %v54_v16 }
  0x12   :  { %1086 = vmatprep.mubr.msk.f32.mxu0 %vm87_vm1, %v23_v17  ;;  %1134 = vmatprep.mubr.msk.f32.mxu1 %vm87_vm1, %v55_v18 }
  0x15   :  { %1087 = vmatmul.mubr.msk.f32.gmra.mrb[8].mxu0 %vm87_vm1, %v24_v19  ;;  %1135 = vmatmul.mubr.msk.f32.gmra.mrb[8].mxu1 %vm87_vm1, %v56_v20 }
  0x16   :  { %1089 = vmatprep.mubr.msk.f32.mxu0 %vm87_vm1, %v25_v21  ;;  %1137 = vmatprep.mubr.msk.f32.mxu1 %vm87_vm1, %v57_v22 }
  0x17   :  { %8 = vsyncpa [#allocation3], 0  ;;  %v27_v25 = vld [vmem:[%s1562_s0 + $0x60] sm:$0xff]  ;;  %v28_v27 = vld [vmem:[%s1562_s0 + $0x68] sm:$0xff] }
  0x18   :  { %v59_v26 = vld [vmem:[%s1562_s0 + $0x160] sm:$0xff]  ;;  %v60_v28 = vld [vmem:[%s1562_s0 + $0x168] sm:$0xff]  ;;  %v29_v29 = vld [vmem:[%s1562_s0 + $0x70] sm:$0xff] }
  0x19   :  { %1090 = vmatmul.mubr.msk.f32.gmra.mrb[10].mxu0 %vm87_vm1, %v26_v23  ;;  %1138 = vmatmul.mubr.msk.f32.gmra.mrb[10].mxu1 %vm87_vm1, %v58_v24  ;;  %v61_v30 = vld [vmem:[%s1562_s0 + $0x170] sm:$0xff]  ;;  %v30_v31 = vld [vmem:[%s1562_s0 + $0x78] sm:$0xff]  ;;  %v31_v33 = vld [vmem:[%s1562_s0 + $0x80] sm:$0xff] }
  0x1a   :  { %1092 = vmatprep.mubr.msk.f32.mxu0 %vm87_vm1, %v27_v25  ;;  %1140 = vmatprep.mubr.msk.f32.mxu1 %vm87_vm1, %v59_v26  ;;  %v62_v32 = vld [vmem:[%s1562_s0 + $0x178] sm:$0xff]  ;;  %v63_v34 = vld [vmem:[%s1562_s0 + $0x180] sm:$0xff]  ;;  %v32_v35 = vld [vmem:[%s1562_s0 + $0x88] sm:$0xff] }
  0x1b   :  { %v64_v36 = vld [vmem:[%s1562_s0 + $0x188] sm:$0xff]  ;;  %v33_v37 = vld [vmem:[%s1562_s0 + $0x90] sm:$0xff]  ;;  %v34_v39 = vld [vmem:[%s1562_s0 + $0x98] sm:$0xff] }
  0x1c   :  { %v65_v38 = vld [vmem:[%s1562_s0 + $0x190] sm:$0xff]  ;;  %v66_v40 = vld [vmem:[%s1562_s0 + $0x198] sm:$0xff]  ;;  %v35_v41 = vld [vmem:[%s1562_s0 + $0xa0] sm:$0xff] }
  0x1d   :  { %1093 = vmatmul.mubr.msk.f32.gmra.mrb[12].mxu0 %vm87_vm1, %v28_v27  ;;  %1141 = vmatmul.mubr.msk.f32.gmra.mrb[12].mxu1 %vm87_vm1, %v60_v28  ;;  %v67_v42 = vld [vmem:[%s1562_s0 + $0x1a0] sm:$0xff]  ;;  %v36_v43 = vld [vmem:[%s1562_s0 + $0xa8] sm:$0xff]  ;;  %v37_v45 = vld [vmem:[%s1562_s0 + $0xb0] sm:$0xff] }
  0x1e   :  { %1095 = vmatprep.mubr.msk.f32.mxu0 %vm87_vm1, %v29_v29  ;;  %1143 = vmatprep.mubr.msk.f32.mxu1 %vm87_vm1, %v61_v30  ;;  %v68_v44 = vld [vmem:[%s1562_s0 + $0x1a8] sm:$0xff]  ;;  %v69_v46 = vld [vmem:[%s1562_s0 + $0x1b0] sm:$0xff]  ;;  %v38_v47 = vld [vmem:[%s1562_s0 + $0xb8] sm:$0xff] }
  0x1f   :  { %v70_v48 = vld [vmem:[%s1562_s0 + $0x1b8] sm:$0xff]  ;;  %v39_v49 = vld [vmem:[%s1562_s0 + $0xc0] sm:$0xff]  ;;  %v40_v51 = vld [vmem:[%s1562_s0 + $0xc8] sm:$0xff] }
  0x20   :  { %v71_v50 = vld [vmem:[%s1562_s0 + $0x1c0] sm:$0xff]  ;;  %v72_v52 = vld [vmem:[%s1562_s0 + $0x1c8] sm:$0xff]  ;;  %v41_v53 = vld [vmem:[%s1562_s0 + $0xd0] sm:$0xff] }
  0x21   :  { %1096 = vmatmul.mubr.msk.f32.gmra.mrb[14].mxu0 %vm87_vm1, %v30_v31  ;;  %1144 = vmatmul.mubr.msk.f32.gmra.mrb[14].mxu1 %vm87_vm1, %v62_v32  ;;  %v73_v54 = vld [vmem:[%s1562_s0 + $0x1d0] sm:$0xff]  ;;  %v42_v55 = vld [vmem:[%s1562_s0 + $0xd8] sm:$0xff]  ;;  %v43_v57 = vld [vmem:[%s1562_s0 + $0xe0] sm:$0xff] }
  0x22   :  { %1098 = vmatprep.mubr.msk.f32.mxu0 %vm87_vm1, %v31_v33  ;;  %1146 = vmatprep.mubr.msk.f32.mxu1 %vm87_vm1, %v63_v34  ;;  %v74_v56 = vld [vmem:[%s1562_s0 + $0x1d8] sm:$0xff]  ;;  %v75_v58 = vld [vmem:[%s1562_s0 + $0x1e0] sm:$0xff]  ;;  %v44_v59 = vld [vmem:[%s1562_s0 + $0xe8] sm:$0xff] }
  0x23   :  { %v76_v60 = vld [vmem:[%s1562_s0 + $0x1e8] sm:$0xff]  ;;  %v45_v61 = vld [vmem:[%s1562_s0 + $0xf0] sm:$0xff]  ;;  %v46_v63 = vld [vmem:[%s1562_s0 + $0xf8] sm:$0xff] }
  0x24   :  { %v77_v62 = vld [vmem:[%s1562_s0 + $0x1f0] sm:$0xff]  ;;  %v78_v0 = vld [vmem:[%s1562_s0 + $0x1f8] sm:$0xff]  ;;  %v1484_v1 = vld [vmem:[%s1564_s2] ss:$0 sm:$0xff]  ;;  %s1199_s0 = smov [#allocation2]  }
  0x25   :  { %1099 = vmatmul.mubr.msk.f32.gmra.mrb[16].mxu0 %vm87_vm1, %v32_v35  ;;  %1147 = vmatmul.mubr.msk.f32.gmra.mrb[16].mxu1 %vm87_vm1, %v64_v36  ;;  %s930_s2 = sshll.u32 %s1199_s0, 4  ;;  %s931_s2 = int_to_ptr.vmem [resolvable:$true] %s930_s2 }
  0x26   :  { %1101 = vmatprep.mubr.msk.f32.mxu0 %vm87_vm1, %v33_v37  ;;  %1149 = vmatprep.mubr.msk.f32.mxu1 %vm87_vm1, %v65_v38  ;;  %s1175_s4 = scalar_lea.vmem %s931_s2, 8192  ;;  %p1180_p1 = scmp.lt.s32.totalorder %s931_s2, %s931_s2 }
  0x27   :  { %p1176_p0 = scmp.ne.s32.totalorder %s931_s2, %s1175_s4  ;;  %p1181_p2 = scmp.lt.s32.totalorder %s1175_s4, %s1175_s4 }
  0x29   :  { %1102 = vmatmul.mubr.msk.f32.gmra.mrb[18].mxu0 %vm87_vm1, %v34_v39  ;;  %1150 = vmatmul.mubr.msk.f32.gmra.mrb[18].mxu1 %vm87_vm1, %v66_v40  ;;  %p1182_p3 = por %p1181_p2, %p1180_p1 }
  0x2a   :  { %1104 = vmatprep.mubr.msk.f32.mxu0 %vm87_vm1, %v35_v41  ;;  %1152 = vmatprep.mubr.msk.f32.mxu1 %vm87_vm1, %v67_v42 }
  0x2b   :  { %p1183_p4 = pnand %p1182_p3, %p1176_p0 }
  0x2d   :  { %1105 = vmatmul.mubr.msk.f32.gmra.mrb[20].mxu0 %vm87_vm1, %v36_v43  ;;  %1153 = vmatmul.mubr.msk.f32.gmra.mrb[20].mxu1 %vm87_vm1, %v68_v44 }
  0x2e   :  { %1107 = vmatprep.mubr.msk.f32.mxu0 %vm87_vm1, %v37_v45  ;;  %1155 = vmatprep.mubr.msk.f32.mxu1 %vm87_vm1, %v69_v46 }
  0x31   :  { %1108 = vmatmul.mubr.msk.f32.gmra.mrb[22].mxu0 %vm87_vm1, %v38_v47  ;;  %1156 = vmatmul.mubr.msk.f32.gmra.mrb[22].mxu1 %vm87_vm1, %v70_v48 }
  0x32   :  { %1110 = vmatprep.mubr.msk.f32.mxu0 %vm87_vm1, %v39_v49  ;;  %1158 = vmatprep.mubr.msk.f32.mxu1 %vm87_vm1, %v71_v50 }
  0x35   :  { %1111 = vmatmul.mubr.msk.f32.gmra.mrb[24].mxu0 %vm87_vm1, %v40_v51  ;;  %1159 = vmatmul.mubr.msk.f32.gmra.mrb[24].mxu1 %vm87_vm1, %v72_v52 }
  0x36   :  { %1113 = vmatprep.mubr.msk.f32.mxu0 %vm87_vm1, %v41_v53  ;;  %1161 = vmatprep.mubr.msk.f32.mxu1 %vm87_vm1, %v73_v54 }
  0x39   :  { %1114 = vmatmul.mubr.msk.f32.gmra.mrb[26].mxu0 %vm87_vm1, %v42_v55  ;;  %1162 = vmatmul.mubr.msk.f32.gmra.mrb[26].mxu1 %vm87_vm1, %v74_v56 }
  0x3a   :  { %1116 = vmatprep.mubr.msk.f32.mxu0 %vm87_vm1, %v43_v57  ;;  %1164 = vmatprep.mubr.msk.f32.mxu1 %vm87_vm1, %v75_v58 }
  0x3d   :  { %1117 = vmatmul.mubr.msk.f32.gmra.mrb[28].mxu0 %vm87_vm1, %v44_v59  ;;  %1165 = vmatmul.mubr.msk.f32.gmra.mrb[28].mxu1 %vm87_vm1, %v76_v60 }
  0x3e   :  { %1119 = vmatprep.mubr.msk.f32.mxu0 %vm87_vm1, %v45_v61  ;;  %1167 = vmatprep.mubr.msk.f32.mxu1 %vm87_vm1, %v77_v62 }
  0x41   :  { %1120 = vmatmul.mubr.msk.f32.gmra.mrb[30].mxu0 %vm87_vm1, %v46_v63  ;;  %1168 = vmatmul.mubr.msk.f32.gmra.mrb[30].mxu1 %vm87_vm1, %v78_v0 }
  0xd8   :  { %v1076_v2 = vpop.f32.mrb[0].mxu0  ;;  %v1124_v3 = vpop.f32.mrb[0].mxu1 }
  0xd9   :  { %v356_v4 = vadd.f32 %v1076_v2, %v1484_v1  ;;  %v516_v5 = vadd.f32 %v1124_v3, %v1484_v1  ;;  %v350_v6 = vpop.f32.mrb[1].mxu0  ;;  %v510_v7 = vpop.f32.mrb[1].mxu1 }
  0xda   :  { %v351_v8 = vadd.f32 %v1484_v1, %v350_v6  ;;  %v511_v9 = vadd.f32 %v1484_v1, %v510_v7 }
  0xdb   :  { %vm670_vm2 = vcmp.ge.f32.partialorder %v356_v4, 0.0  ;;  %v734_v10 = vmul.f32 0.1, %v356_v4  ;;  %vm702_vm3 = vcmp.ge.f32.partialorder %v516_v5, 0.0  ;;  %v766_v11 = vmul.f32 0.1, %v516_v5 }
  0xdc   :  { %vm669_vm4 = vcmp.ge.f32.partialorder %v351_v8, 0.0  ;;  %v733_v12 = vmul.f32 0.1, %v351_v8  ;;  %vm701_vm5 = vcmp.ge.f32.partialorder %v511_v9, 0.0  ;;  %v765_v13 = vmul.f32 0.1, %v511_v9 }
  0xdd   :  { %v798_v14 = vsel %vm670_vm2, %v356_v4, %v734_v10  ;;  %v830_v15 = vsel %vm702_vm3, %v516_v5, %v766_v11  ;;  %v1079_v16 = vpop.f32.mrb[2].mxu0  ;;  %v1127_v17 = vpop.f32.mrb[2].mxu1 }
  0xde   :  { %862 = vst [vmem:[#allocation2 + $0x8] sm:$0xff] %v798_v14  ;;  %894 = vst [vmem:[#allocation2 + $0x108] sm:$0xff] %v830_v15  ;;  %v797_v18 = vsel %vm669_vm4, %v351_v8, %v733_v12  ;;  %v829_v19 = vsel %vm701_vm5, %v511_v9, %v765_v13  ;;  %v366_v20 = vadd.f32 %v1079_v16, %v1484_v1  ;;  %v360_v22 = vpop.f32.mrb[3].mxu0  ;;  %v520_v23 = vpop.f32.mrb[3].mxu1 }
  0xdf   :  { %v526_v21 = vadd.f32 %v1127_v17, %v1484_v1  ;;  %861 = vst [vmem:[#allocation2] sm:$0xff] %v797_v18  ;;  %893 = vst [vmem:[#allocation2 + $0x100] sm:$0xff] %v829_v19  ;;  %v361_v24 = vadd.f32 %v1484_v1, %v360_v22  ;;  %v521_v25 = vadd.f32 %v1484_v1, %v520_v23 }
  0xe0   :  { %vm672_vm6 = vcmp.ge.f32.partialorder %v366_v20, 0.0  ;;  %v736_v26 = vmul.f32 0.1, %v366_v20  ;;  %v1082_v32 = vpop.f32.mrb[4].mxu0  ;;  %v1130_v33 = vpop.f32.mrb[4].mxu1 }
  0xe1   :  { %vm704_vm7 = vcmp.ge.f32.partialorder %v526_v21, 0.0  ;;  %v768_v27 = vmul.f32 0.1, %v526_v21  ;;  %vm671_vm8 = vcmp.ge.f32.partialorder %v361_v24, 0.0  ;;  %v735_v28 = vmul.f32 0.1, %v361_v24 }
  0xe2   :  { %vm703_vm9 = vcmp.ge.f32.partialorder %v521_v25, 0.0  ;;  %v767_v29 = vmul.f32 0.1, %v521_v25  ;;  %v800_v30 = vsel %vm672_vm6, %v366_v20, %v736_v26  ;;  %v376_v36 = vadd.f32 %v1082_v32, %v1484_v1  ;;  %v370_v38 = vpop.f32.mrb[5].mxu0  ;;  %v530_v39 = vpop.f32.mrb[5].mxu1 }
  0xe3   :  { %v832_v31 = vsel %vm704_vm7, %v526_v21, %v768_v27  ;;  %864 = vst [vmem:[#allocation2 + $0x18] sm:$0xff] %v800_v30  ;;  %v799_v34 = vsel %vm671_vm8, %v361_v24, %v735_v28  ;;  %v536_v37 = vadd.f32 %v1130_v33, %v1484_v1  ;;  %v371_v40 = vadd.f32 %v1484_v1, %v370_v38 }
  0xe4   :  { %896 = vst [vmem:[#allocation2 + $0x118] sm:$0xff] %v832_v31  ;;  %v831_v35 = vsel %vm703_vm9, %v521_v25, %v767_v29  ;;  %863 = vst [vmem:[#allocation2 + $0x10] sm:$0xff] %v799_v34  ;;  %v531_v41 = vadd.f32 %v1484_v1, %v530_v39  ;;  %v1085_v42 = vpop.f32.mrb[6].mxu0  ;;  %v1133_v43 = vpop.f32.mrb[6].mxu1  ;;  %vm674_vm10 = vcmp.ge.f32.partialorder %v376_v36, 0.0 }
  0xe5   :  { %895 = vst [vmem:[#allocation2 + $0x110] sm:$0xff] %v831_v35  ;;  %v738_v44 = vmul.f32 0.1, %v376_v36  ;;  %vm706_vm11 = vcmp.ge.f32.partialorder %v536_v37, 0.0  ;;  %v770_v45 = vmul.f32 0.1, %v536_v37  ;;  %v386_v50 = vadd.f32 %v1085_v42, %v1484_v1 }
  0xe6   :  { %vm673_vm12 = vcmp.ge.f32.partialorder %v371_v40, 0.0  ;;  %v737_v46 = vmul.f32 0.1, %v371_v40  ;;  %vm705_vm13 = vcmp.ge.f32.partialorder %v531_v41, 0.0  ;;  %v769_v47 = vmul.f32 0.1, %v531_v41 }
  0xe7   :  { %v802_v48 = vsel %vm674_vm10, %v376_v36, %v738_v44  ;;  %v834_v49 = vsel %vm706_vm11, %v536_v37, %v770_v45  ;;  %v546_v51 = vadd.f32 %v1133_v43, %v1484_v1  ;;  %v380_v52 = vpop.f32.mrb[7].mxu0  ;;  %v540_v53 = vpop.f32.mrb[7].mxu1  ;;  %vm676_vm14 = vcmp.ge.f32.partialorder %v386_v50, 0.0 }
  0xe8   :  { %866 = vst [vmem:[#allocation2 + $0x28] sm:$0xff] %v802_v48  ;;  %898 = vst [vmem:[#allocation2 + $0x128] sm:$0xff] %v834_v49  ;;  %v801_v54 = vsel %vm673_vm12, %v371_v40, %v737_v46  ;;  %v833_v55 = vsel %vm705_vm13, %v531_v41, %v769_v47  ;;  %v381_v56 = vadd.f32 %v1484_v1, %v380_v52  ;;  %v1088_v58 = vpop.f32.mrb[8].mxu0  ;;  %v1136_v59 = vpop.f32.mrb[8].mxu1  ;;  %v740_v60 = vmul.f32 0.1, %v386_v50 }
  0xe9   :  { %v541_v57 = vadd.f32 %v1484_v1, %v540_v53  ;;  %865 = vst [vmem:[#allocation2 + $0x20] sm:$0xff] %v801_v54  ;;  %897 = vst [vmem:[#allocation2 + $0x120] sm:$0xff] %v833_v55  ;;  %vm708_vm15 = vcmp.ge.f32.partialorder %v546_v51, 0.0  ;;  %v772_v61 = vmul.f32 0.1, %v546_v51  ;;  %v396_v3 = vadd.f32 %v1088_v58, %v1484_v1  ;;  %v390_v5 = vpop.f32.mrb[9].mxu0 }
  0xea   :  { %vm675_vm0 = vcmp.ge.f32.partialorder %v381_v56, 0.0  ;;  %v739_v62 = vmul.f32 0.1, %v381_v56  ;;  %v804_v0 = vsel %vm676_vm14, %v386_v50, %v740_v60  ;;  %v556_v4 = vadd.f32 %v1136_v59, %v1484_v1  ;;  %v550_v6 = vpop.f32.mrb[9].mxu1 }
  0xeb   :  { %vm707_vm1 = vcmp.ge.f32.partialorder %v541_v57, 0.0  ;;  %v771_v63 = vmul.f32 0.1, %v541_v57  ;;  %v836_v2 = vsel %vm708_vm15, %v546_v51, %v772_v61  ;;  %868 = vst [vmem:[#allocation2 + $0x38] sm:$0xff] %v804_v0  ;;  %v391_v9 = vadd.f32 %v1484_v1, %v390_v5 }
  0xec   :  { %900 = vst [vmem:[#allocation2 + $0x138] sm:$0xff] %v836_v2  ;;  %v803_v7 = vsel %vm675_vm0, %v381_v56, %v739_v62  ;;  %v551_v10 = vadd.f32 %v1484_v1, %v550_v6  ;;  %v1091_v11 = vpop.f32.mrb[10].mxu0  ;;  %v1139_v12 = vpop.f32.mrb[10].mxu1  ;;  %vm678_vm2 = vcmp.ge.f32.partialorder %v396_v3, 0.0  ;;  %v742_v13 = vmul.f32 0.1, %v396_v3 }
  0xed   :  { %v835_v8 = vsel %vm707_vm1, %v541_v57, %v771_v63  ;;  %867 = vst [vmem:[#allocation2 + $0x30] sm:$0xff] %v803_v7  ;;  %vm710_vm3 = vcmp.ge.f32.partialorder %v556_v4, 0.0  ;;  %v774_v14 = vmul.f32 0.1, %v556_v4  ;;  %vm677_vm4 = vcmp.ge.f32.partialorder %v391_v9, 0.0  ;;  %v400_v21 = vpop.f32.mrb[11].mxu0 }
  0xee   :  { %899 = vst [vmem:[#allocation2 + $0x130] sm:$0xff] %v835_v8  ;;  %v741_v15 = vmul.f32 0.1, %v391_v9  ;;  %vm709_vm5 = vcmp.ge.f32.partialorder %v551_v10, 0.0  ;;  %v773_v16 = vmul.f32 0.1, %v551_v10  ;;  %v806_v17 = vsel %vm678_vm2, %v396_v3, %v742_v13 }
  0xef   :  { %v838_v18 = vsel %vm710_vm3, %v556_v4, %v774_v14  ;;  %v406_v19 = vadd.f32 %v1091_v11, %v1484_v1  ;;  %v566_v20 = vadd.f32 %v1139_v12, %v1484_v1  ;;  %v560_v22 = vpop.f32.mrb[11].mxu1  ;;  %870 = vst [vmem:[#allocation2 + $0x48] sm:$0xff] %v806_v17  ;;  %v401_v25 = vadd.f32 %v1484_v1, %v400_v21 }
  0xf0   :  { %902 = vst [vmem:[#allocation2 + $0x148] sm:$0xff] %v838_v18  ;;  %v805_v23 = vsel %vm677_vm4, %v391_v9, %v741_v15  ;;  %v837_v24 = vsel %vm709_vm5, %v551_v10, %v773_v16  ;;  %v561_v26 = vadd.f32 %v1484_v1, %v560_v22  ;;  %v1094_v27 = vpop.f32.mrb[12].mxu0  ;;  %v1142_v28 = vpop.f32.mrb[12].mxu1 }
  0xf1   :  { %869 = vst [vmem:[#allocation2 + $0x40] sm:$0xff] %v805_v23  ;;  %901 = vst [vmem:[#allocation2 + $0x140] sm:$0xff] %v837_v24  ;;  %vm680_vm6 = vcmp.ge.f32.partialorder %v406_v19, 0.0  ;;  %v744_v29 = vmul.f32 0.1, %v406_v19  ;;  %vm712_vm7 = vcmp.ge.f32.partialorder %v566_v20, 0.0  ;;  %v416_v35 = vadd.f32 %v1094_v27, %v1484_v1 }
  0xf2   :  { %v776_v30 = vmul.f32 0.1, %v566_v20  ;;  %vm679_vm8 = vcmp.ge.f32.partialorder %v401_v25, 0.0  ;;  %v743_v31 = vmul.f32 0.1, %v401_v25  ;;  %vm711_vm9 = vcmp.ge.f32.partialorder %v561_v26, 0.0 }
  0xf3   :  { %v775_v32 = vmul.f32 0.1, %v561_v26  ;;  %v808_v33 = vsel %vm680_vm6, %v406_v19, %v744_v29  ;;  %v576_v36 = vadd.f32 %v1142_v28, %v1484_v1  ;;  %v410_v37 = vpop.f32.mrb[13].mxu0  ;;  %v570_v38 = vpop.f32.mrb[13].mxu1  ;;  %vm682_vm10 = vcmp.ge.f32.partialorder %v416_v35, 0.0 }
  0xf4   :  { %v840_v34 = vsel %vm712_vm7, %v566_v20, %v776_v30  ;;  %872 = vst [vmem:[#allocation2 + $0x58] sm:$0xff] %v808_v33  ;;  %v807_v39 = vsel %vm679_vm8, %v401_v25, %v743_v31  ;;  %v411_v41 = vadd.f32 %v1484_v1, %v410_v37  ;;  %v571_v42 = vadd.f32 %v1484_v1, %v570_v38  ;;  %v1097_v43 = vpop.f32.mrb[14].mxu0  ;;  %v1145_v44 = vpop.f32.mrb[14].mxu1 }
  0xf5   :  { %904 = vst [vmem:[#allocation2 + $0x158] sm:$0xff] %v840_v34  ;;  %v839_v40 = vsel %vm711_vm9, %v561_v26, %v775_v32  ;;  %871 = vst [vmem:[#allocation2 + $0x50] sm:$0xff] %v807_v39  ;;  %v746_v45 = vmul.f32 0.1, %v416_v35  ;;  %vm714_vm11 = vcmp.ge.f32.partialorder %v576_v36, 0.0  ;;  %v426_v51 = vadd.f32 %v1097_v43, %v1484_v1  ;;  %v420_v53 = vpop.f32.mrb[15].mxu0 }
  0xf6   :  { %903 = vst [vmem:[#allocation2 + $0x150] sm:$0xff] %v839_v40  ;;  %v778_v46 = vmul.f32 0.1, %v576_v36  ;;  %vm681_vm12 = vcmp.ge.f32.partialorder %v411_v41, 0.0  ;;  %v745_v47 = vmul.f32 0.1, %v411_v41  ;;  %v586_v52 = vadd.f32 %v1145_v44, %v1484_v1 }
  0xf7   :  { %vm713_vm13 = vcmp.ge.f32.partialorder %v571_v42, 0.0  ;;  %v777_v48 = vmul.f32 0.1, %v571_v42  ;;  %v810_v49 = vsel %vm682_vm10, %v416_v35, %v746_v45  ;;  %v580_v54 = vpop.f32.mrb[15].mxu1  ;;  %v421_v57 = vadd.f32 %v1484_v1, %v420_v53 }
  0xf8   :  { %v842_v50 = vsel %vm714_vm11, %v576_v36, %v778_v46  ;;  %874 = vst [vmem:[#allocation2 + $0x68] sm:$0xff] %v810_v49  ;;  %v809_v55 = vsel %vm681_vm12, %v411_v41, %v745_v47  ;;  %v581_v58 = vadd.f32 %v1484_v1, %v580_v54  ;;  %v1100_v59 = vpop.f32.mrb[16].mxu0  ;;  %v1148_v60 = vpop.f32.mrb[16].mxu1  ;;  %vm684_vm14 = vcmp.ge.f32.partialorder %v426_v51, 0.0 }
  0xf9   :  { %906 = vst [vmem:[#allocation2 + $0x168] sm:$0xff] %v842_v50  ;;  %v841_v56 = vsel %vm713_vm13, %v571_v42, %v777_v48  ;;  %873 = vst [vmem:[#allocation2 + $0x60] sm:$0xff] %v809_v55  ;;  %v748_v61 = vmul.f32 0.1, %v426_v51  ;;  %vm716_vm15 = vcmp.ge.f32.partialorder %v586_v52, 0.0  ;;  %vm683_vm0 = vcmp.ge.f32.partialorder %v421_v57, 0.0 }
  0xfa   :  { %905 = vst [vmem:[#allocation2 + $0x160] sm:$0xff] %v841_v56  ;;  %v780_v62 = vmul.f32 0.1, %v586_v52  ;;  %v747_v63 = vmul.f32 0.1, %v421_v57  ;;  %vm715_vm1 = vcmp.ge.f32.partialorder %v581_v58, 0.0  ;;  %v436_v4 = vadd.f32 %v1100_v59, %v1484_v1 }
  0xfb   :  { %v779_v0 = vmul.f32 0.1, %v581_v58  ;;  %v812_v2 = vsel %vm684_vm14, %v426_v51, %v748_v61  ;;  %v596_v5 = vadd.f32 %v1148_v60, %v1484_v1  ;;  %v430_v6 = vpop.f32.mrb[17].mxu0  ;;  %v590_v7 = vpop.f32.mrb[17].mxu1 }
  0xfc   :  { %v844_v3 = vsel %vm716_vm15, %v586_v52, %v780_v62  ;;  %876 = vst [vmem:[#allocation2 + $0x78] sm:$0xff] %v812_v2  ;;  %v811_v8 = vsel %vm683_vm0, %v421_v57, %v747_v63  ;;  %v431_v10 = vadd.f32 %v1484_v1, %v430_v6  ;;  %v591_v11 = vadd.f32 %v1484_v1, %v590_v7  ;;  %v1103_v12 = vpop.f32.mrb[18].mxu0  ;;  %v1151_v13 = vpop.f32.mrb[18].mxu1 }
  0xfd   :  { %908 = vst [vmem:[#allocation2 + $0x178] sm:$0xff] %v844_v3  ;;  %v843_v9 = vsel %vm715_vm1, %v581_v58, %v779_v0  ;;  %875 = vst [vmem:[#allocation2 + $0x70] sm:$0xff] %v811_v8  ;;  %vm686_vm2 = vcmp.ge.f32.partialorder %v436_v4, 0.0  ;;  %v750_v14 = vmul.f32 0.1, %v436_v4  ;;  %vm718_vm3 = vcmp.ge.f32.partialorder %v596_v5, 0.0 }
  0xfe   :  { %907 = vst [vmem:[#allocation2 + $0x170] sm:$0xff] %v843_v9  ;;  %v782_v15 = vmul.f32 0.1, %v596_v5  ;;  %vm685_vm4 = vcmp.ge.f32.partialorder %v431_v10, 0.0  ;;  %v749_v16 = vmul.f32 0.1, %v431_v10  ;;  %v446_v20 = vadd.f32 %v1103_v12, %v1484_v1 }
  0xff   :  { %vm717_vm5 = vcmp.ge.f32.partialorder %v591_v11, 0.0  ;;  %v781_v17 = vmul.f32 0.1, %v591_v11  ;;  %v814_v18 = vsel %vm686_vm2, %v436_v4, %v750_v14  ;;  %v606_v21 = vadd.f32 %v1151_v13, %v1484_v1  ;;  %v440_v22 = vpop.f32.mrb[19].mxu0  ;;  %v600_v23 = vpop.f32.mrb[19].mxu1 }
 0x100   :  { %v846_v19 = vsel %vm718_vm3, %v596_v5, %v782_v15  ;;  %878 = vst [vmem:[#allocation2 + $0x88] sm:$0xff] %v814_v18  ;;  %v813_v24 = vsel %vm685_vm4, %v431_v10, %v749_v16  ;;  %v441_v26 = vadd.f32 %v1484_v1, %v440_v22  ;;  %v601_v27 = vadd.f32 %v1484_v1, %v600_v23  ;;  %v1106_v28 = vpop.f32.mrb[20].mxu0  ;;  %v1154_v29 = vpop.f32.mrb[20].mxu1 }
 0x101   :  { %910 = vst [vmem:[#allocation2 + $0x188] sm:$0xff] %v846_v19  ;;  %v845_v25 = vsel %vm717_vm5, %v591_v11, %v781_v17  ;;  %877 = vst [vmem:[#allocation2 + $0x80] sm:$0xff] %v813_v24  ;;  %vm688_vm6 = vcmp.ge.f32.partialorder %v446_v20, 0.0  ;;  %v752_v30 = vmul.f32 0.1, %v446_v20  ;;  %vm720_vm7 = vcmp.ge.f32.partialorder %v606_v21, 0.0 }
 0x102   :  { %909 = vst [vmem:[#allocation2 + $0x180] sm:$0xff] %v845_v25  ;;  %v784_v31 = vmul.f32 0.1, %v606_v21  ;;  %vm687_vm8 = vcmp.ge.f32.partialorder %v441_v26, 0.0  ;;  %v751_v32 = vmul.f32 0.1, %v441_v26  ;;  %v456_v36 = vadd.f32 %v1106_v28, %v1484_v1 }
 0x103   :  { %vm719_vm9 = vcmp.ge.f32.partialorder %v601_v27, 0.0  ;;  %v783_v33 = vmul.f32 0.1, %v601_v27  ;;  %v816_v34 = vsel %vm688_vm6, %v446_v20, %v752_v30  ;;  %v616_v37 = vadd.f32 %v1154_v29, %v1484_v1  ;;  %v450_v38 = vpop.f32.mrb[21].mxu0  ;;  %v610_v39 = vpop.f32.mrb[21].mxu1 }
 0x104   :  { %v848_v35 = vsel %vm720_vm7, %v606_v21, %v784_v31  ;;  %880 = vst [vmem:[#allocation2 + $0x98] sm:$0xff] %v816_v34  ;;  %v815_v40 = vsel %vm687_vm8, %v441_v26, %v751_v32  ;;  %v451_v42 = vadd.f32 %v1484_v1, %v450_v38  ;;  %v611_v43 = vadd.f32 %v1484_v1, %v610_v39  ;;  %v1109_v44 = vpop.f32.mrb[22].mxu0  ;;  %v1157_v45 = vpop.f32.mrb[22].mxu1 }
 0x105   :  { %912 = vst [vmem:[#allocation2 + $0x198] sm:$0xff] %v848_v35  ;;  %v847_v41 = vsel %vm719_vm9, %v601_v27, %v783_v33  ;;  %879 = vst [vmem:[#allocation2 + $0x90] sm:$0xff] %v815_v40  ;;  %vm690_vm10 = vcmp.ge.f32.partialorder %v456_v36, 0.0  ;;  %v754_v46 = vmul.f32 0.1, %v456_v36  ;;  %vm722_vm11 = vcmp.ge.f32.partialorder %v616_v37, 0.0 }
 0x106   :  { %911 = vst [vmem:[#allocation2 + $0x190] sm:$0xff] %v847_v41  ;;  %v786_v47 = vmul.f32 0.1, %v616_v37  ;;  %vm689_vm12 = vcmp.ge.f32.partialorder %v451_v42, 0.0  ;;  %v753_v48 = vmul.f32 0.1, %v451_v42  ;;  %v466_v52 = vadd.f32 %v1109_v44, %v1484_v1 }
 0x107   :  { %vm721_vm13 = vcmp.ge.f32.partialorder %v611_v43, 0.0  ;;  %v785_v49 = vmul.f32 0.1, %v611_v43  ;;  %v818_v50 = vsel %vm690_vm10, %v456_v36, %v754_v46  ;;  %v626_v53 = vadd.f32 %v1157_v45, %v1484_v1  ;;  %v460_v54 = vpop.f32.mrb[23].mxu0  ;;  %v620_v55 = vpop.f32.mrb[23].mxu1 }
 0x108   :  { %v850_v51 = vsel %vm722_vm11, %v616_v37, %v786_v47  ;;  %882 = vst [vmem:[#allocation2 + $0xa8] sm:$0xff] %v818_v50  ;;  %v817_v56 = vsel %vm689_vm12, %v451_v42, %v753_v48  ;;  %v461_v58 = vadd.f32 %v1484_v1, %v460_v54  ;;  %v621_v59 = vadd.f32 %v1484_v1, %v620_v55  ;;  %v1112_v60 = vpop.f32.mrb[24].mxu0  ;;  %v1160_v61 = vpop.f32.mrb[24].mxu1 }
 0x109   :  { %914 = vst [vmem:[#allocation2 + $0x1a8] sm:$0xff] %v850_v51  ;;  %v849_v57 = vsel %vm721_vm13, %v611_v43, %v785_v49  ;;  %881 = vst [vmem:[#allocation2 + $0xa0] sm:$0xff] %v817_v56  ;;  %vm692_vm14 = vcmp.ge.f32.partialorder %v466_v52, 0.0  ;;  %v756_v62 = vmul.f32 0.1, %v466_v52  ;;  %vm724_vm15 = vcmp.ge.f32.partialorder %v626_v53, 0.0 }
 0x10a   :  { %913 = vst [vmem:[#allocation2 + $0x1a0] sm:$0xff] %v849_v57  ;;  %v788_v63 = vmul.f32 0.1, %v626_v53  ;;  %vm691_vm0 = vcmp.ge.f32.partialorder %v461_v58, 0.0  ;;  %v755_v0 = vmul.f32 0.1, %v461_v58  ;;  %v476_v5 = vadd.f32 %v1112_v60, %v1484_v1 }
 0x10b   :  { %vm723_vm1 = vcmp.ge.f32.partialorder %v621_v59, 0.0  ;;  %v787_v2 = vmul.f32 0.1, %v621_v59  ;;  %v820_v3 = vsel %vm692_vm14, %v466_v52, %v756_v62  ;;  %v636_v6 = vadd.f32 %v1160_v61, %v1484_v1  ;;  %v470_v7 = vpop.f32.mrb[25].mxu0  ;;  %v630_v8 = vpop.f32.mrb[25].mxu1 }
 0x10c   :  { %v852_v4 = vsel %vm724_vm15, %v626_v53, %v788_v63  ;;  %884 = vst [vmem:[#allocation2 + $0xb8] sm:$0xff] %v820_v3  ;;  %v819_v9 = vsel %vm691_vm0, %v461_v58, %v755_v0  ;;  %v471_v11 = vadd.f32 %v1484_v1, %v470_v7  ;;  %v631_v12 = vadd.f32 %v1484_v1, %v630_v8  ;;  %v1115_v13 = vpop.f32.mrb[26].mxu0  ;;  %v1163_v14 = vpop.f32.mrb[26].mxu1 }
 0x10d   :  { %916 = vst [vmem:[#allocation2 + $0x1b8] sm:$0xff] %v852_v4  ;;  %v851_v10 = vsel %vm723_vm1, %v621_v59, %v787_v2  ;;  %883 = vst [vmem:[#allocation2 + $0xb0] sm:$0xff] %v819_v9  ;;  %vm694_vm2 = vcmp.ge.f32.partialorder %v476_v5, 0.0  ;;  %v758_v15 = vmul.f32 0.1, %v476_v5  ;;  %vm726_vm3 = vcmp.ge.f32.partialorder %v636_v6, 0.0 }
 0x10e   :  { %915 = vst [vmem:[#allocation2 + $0x1b0] sm:$0xff] %v851_v10  ;;  %v790_v16 = vmul.f32 0.1, %v636_v6  ;;  %vm693_vm4 = vcmp.ge.f32.partialorder %v471_v11, 0.0  ;;  %v757_v17 = vmul.f32 0.1, %v471_v11  ;;  %v486_v21 = vadd.f32 %v1115_v13, %v1484_v1 }
 0x10f   :  { %vm725_vm5 = vcmp.ge.f32.partialorder %v631_v12, 0.0  ;;  %v789_v18 = vmul.f32 0.1, %v631_v12  ;;  %v822_v19 = vsel %vm694_vm2, %v476_v5, %v758_v15  ;;  %v646_v22 = vadd.f32 %v1163_v14, %v1484_v1  ;;  %v480_v23 = vpop.f32.mrb[27].mxu0  ;;  %v640_v24 = vpop.f32.mrb[27].mxu1 }
 0x110   :  { %v854_v20 = vsel %vm726_vm3, %v636_v6, %v790_v16  ;;  %886 = vst [vmem:[#allocation2 + $0xc8] sm:$0xff] %v822_v19  ;;  %v821_v25 = vsel %vm693_vm4, %v471_v11, %v757_v17  ;;  %v481_v27 = vadd.f32 %v1484_v1, %v480_v23  ;;  %v641_v28 = vadd.f32 %v1484_v1, %v640_v24  ;;  %v1118_v29 = vpop.f32.mrb[28].mxu0  ;;  %v1166_v30 = vpop.f32.mrb[28].mxu1 }
 0x111   :  { %918 = vst [vmem:[#allocation2 + $0x1c8] sm:$0xff] %v854_v20  ;;  %v853_v26 = vsel %vm725_vm5, %v631_v12, %v789_v18  ;;  %885 = vst [vmem:[#allocation2 + $0xc0] sm:$0xff] %v821_v25  ;;  %vm696_vm6 = vcmp.ge.f32.partialorder %v486_v21, 0.0  ;;  %v760_v31 = vmul.f32 0.1, %v486_v21  ;;  %vm728_vm7 = vcmp.ge.f32.partialorder %v646_v22, 0.0 }
 0x112   :  { %917 = vst [vmem:[#allocation2 + $0x1c0] sm:$0xff] %v853_v26  ;;  %v792_v32 = vmul.f32 0.1, %v646_v22  ;;  %vm695_vm8 = vcmp.ge.f32.partialorder %v481_v27, 0.0  ;;  %v759_v33 = vmul.f32 0.1, %v481_v27  ;;  %v496_v37 = vadd.f32 %v1118_v29, %v1484_v1 }
 0x113   :  { %vm727_vm9 = vcmp.ge.f32.partialorder %v641_v28, 0.0  ;;  %v791_v34 = vmul.f32 0.1, %v641_v28  ;;  %v824_v35 = vsel %vm696_vm6, %v486_v21, %v760_v31  ;;  %v656_v38 = vadd.f32 %v1166_v30, %v1484_v1  ;;  %v490_v39 = vpop.f32.mrb[29].mxu0  ;;  %v650_v40 = vpop.f32.mrb[29].mxu1 }
 0x114   :  { %v856_v36 = vsel %vm728_vm7, %v646_v22, %v792_v32  ;;  %888 = vst [vmem:[#allocation2 + $0xd8] sm:$0xff] %v824_v35  ;;  %v823_v41 = vsel %vm695_vm8, %v481_v27, %v759_v33  ;;  %v491_v43 = vadd.f32 %v1484_v1, %v490_v39  ;;  %v651_v44 = vadd.f32 %v1484_v1, %v650_v40  ;;  %v1121_v45 = vpop.f32.mrb[30].mxu0  ;;  %v1169_v46 = vpop.f32.mrb[30].mxu1 }
 0x115   :  { %920 = vst [vmem:[#allocation2 + $0x1d8] sm:$0xff] %v856_v36  ;;  %v855_v42 = vsel %vm727_vm9, %v641_v28, %v791_v34  ;;  %887 = vst [vmem:[#allocation2 + $0xd0] sm:$0xff] %v823_v41  ;;  %vm698_vm10 = vcmp.ge.f32.partialorder %v496_v37, 0.0  ;;  %v762_v47 = vmul.f32 0.1, %v496_v37  ;;  %vm730_vm11 = vcmp.ge.f32.partialorder %v656_v38, 0.0 }
 0x116   :  { %919 = vst [vmem:[#allocation2 + $0x1d0] sm:$0xff] %v855_v42  ;;  %v794_v48 = vmul.f32 0.1, %v656_v38  ;;  %vm697_vm12 = vcmp.ge.f32.partialorder %v491_v43, 0.0  ;;  %v761_v49 = vmul.f32 0.1, %v491_v43  ;;  %v506_v53 = vadd.f32 %v1121_v45, %v1484_v1 }
 0x117   :  { %vm729_vm13 = vcmp.ge.f32.partialorder %v651_v44, 0.0  ;;  %v793_v50 = vmul.f32 0.1, %v651_v44  ;;  %v826_v51 = vsel %vm698_vm10, %v496_v37, %v762_v47  ;;  %v666_v54 = vadd.f32 %v1169_v46, %v1484_v1  ;;  %v500_v55 = vpop.f32.mrb[31].mxu0  ;;  %v660_v56 = vpop.f32.mrb[31].mxu1 }
 0x118   :  { %v858_v52 = vsel %vm730_vm11, %v656_v38, %v794_v48  ;;  %890 = vst [vmem:[#allocation2 + $0xe8] sm:$0xff] %v826_v51  ;;  %v825_v57 = vsel %vm697_vm12, %v491_v43, %v761_v49  ;;  %v501_v59 = vadd.f32 %v1484_v1, %v500_v55  ;;  %v661_v60 = vadd.f32 %v1484_v1, %v660_v56 }
 0x119   :  { %922 = vst [vmem:[#allocation2 + $0x1e8] sm:$0xff] %v858_v52  ;;  %v857_v58 = vsel %vm729_vm13, %v651_v44, %v793_v50  ;;  %889 = vst [vmem:[#allocation2 + $0xe0] sm:$0xff] %v825_v57  ;;  %vm700_vm14 = vcmp.ge.f32.partialorder %v506_v53, 0.0  ;;  %v764_v61 = vmul.f32 0.1, %v506_v53  ;;  %vm732_vm15 = vcmp.ge.f32.partialorder %v666_v54, 0.0 }
 0x11a   :  { %921 = vst [vmem:[#allocation2 + $0x1e0] sm:$0xff] %v857_v58  ;;  %v796_v62 = vmul.f32 0.1, %v666_v54  ;;  %vm699_vm0 = vcmp.ge.f32.partialorder %v501_v59, 0.0  ;;  %v763_v63 = vmul.f32 0.1, %v501_v59 }
 0x11b   :  { %vm731_vm1 = vcmp.ge.f32.partialorder %v661_v60, 0.0  ;;  %v795_v0 = vmul.f32 0.1, %v661_v60  ;;  %v828_v2 = vsel %vm700_vm14, %v506_v53, %v764_v61 }
 0x11c   :  { %v860_v3 = vsel %vm732_vm15, %v666_v54, %v796_v62  ;;  %892 = vst [vmem:[#allocation2 + $0xf8] sm:$0xff] %v828_v2  ;;  %v827_v4 = vsel %vm699_vm0, %v501_v59, %v763_v63 }
 0x11d   :  { %924 = vst [vmem:[#allocation2 + $0x1f8] sm:$0xff] %v860_v3  ;;  %v859_v5 = vsel %vm731_vm1, %v661_v60, %v795_v0  ;;  %891 = vst [vmem:[#allocation2 + $0xf0] sm:$0xff] %v827_v4 }
 0x11e   :  { %923 = vst [vmem:[#allocation2 + $0x1f0] sm:$0xff] %v859_v5 }
 0x11f   :  { %1186 = shalt.err (!%p1183_p4)
}
 0x120   :  { %s1187_s7 = scalar_lea.hbm %s1565_s3, 8192 }
 0x121   :  { %p1188_p5 = scmp.ne.s32.totalorder %s1565_s3, %s1187_s7  ;;  %p1191_p6 = scmp.lt.u32.totalorder %s1187_s7, %s1565_s3 }
 0x123   :  { %p1193_p7 = pnand %p1191_p6, %p1188_p5 }
 0x125   :  { %1196 = shalt.err (!%p1193_p7)
}
 0x126   :  { %s1200_s12 = smov 128   ;;  %s1201_s13 = smov 8  }
 0x127   :  { %936 = dma.vmem_to_hbm [thread:$0]  %s931_s2, 8192, %s1565_s3, [#allocation3], %s1200_s12, %s1200_s12, %s1201_s13  }
 0x128   :  { %1197 = dma.done.wait [#allocation3], 8192  }
 0x129   :  { %1198 = vsyncadd [#allocation3], 4294959104 }
 0x12a   :  { %940 = vsyncpa [#allocation3], 1 }

</bundles_post_ra>
